<compile_context>
chip_gen: v7x
topology: tpu7x:2x2x1
jax: 0.10.0
libtpu: 0.0.40
codegen_flags: <defaults>
</compile_context>

<pallas_src>
import functools

import jax
import jax.numpy as jnp
from jax.experimental import pallas as pl
from jax.experimental.pallas import tpu as pltpu


def _round_up(x, m):
    return (x + m - 1) // m * m


def _auto_block_bytes():
    """~4 MiB everywhere; ~8 MiB on v7x-class chips (3.2 TB/s HBM)."""
    try:
        info = pltpu.get_tpu_info()
        vmem = int(getattr(info, "vmem_capacity_bytes", 0) or 0)
        if 0 < vmem <= 64 * 1024 * 1024:      # v7x TensorCore: 64 MiB VMEM
            return 8 * 1024 * 1024
    except Exception:
        pass
    return 4 * 1024 * 1024


def _gap_kernel(x_ref, o_ref, acc_ref, *, inv_hw, s_total, ts, mask_tail):
    """Accumulate row sums of one (tr, ts) chunk; finalize on last spatial step."""
    k = pl.program_id(1)
    n_sp = pl.num_programs(1)

    @pl.when(k == 0)
    def _init():
        acc_ref[...] = jnp.zeros_like(acc_ref)

    x = x_ref[...]

    if mask_tail:
        # Only the final spatial chunk is ragged: keep the iota/compare/select
        # off the steady-state path.
        @pl.when(k < n_sp - 1)
        def _steady():
            acc_ref[...] += jnp.sum(x, axis=1, keepdims=True, dtype=jnp.float32)

        @pl.when(k == n_sp - 1)
        def _tail():
            lane = jax.lax.broadcasted_iota(jnp.int32, x.shape, 1)
            xm = jnp.where(lane + k * ts < s_total, x, jnp.zeros_like(x))
            acc_ref[...] += jnp.sum(xm, axis=1, keepdims=True, dtype=jnp.float32)
    else:
        acc_ref[...] += jnp.sum(x, axis=1, keepdims=True, dtype=jnp.float32)

    @pl.when(k == n_sp - 1)
    def _finalize():
        acc = acc_ref[...]                       # (tr, 1) f32 row sums
        # Single sublane->lane relayout per row block -> lane-dense store.
        o_ref[...] = (acc[:, 0] * inv_hw)[None, :].astype(o_ref.dtype)


def my_adaptive_avg_pool2d(x, *, target_block_bytes=None, max_ts=2048, max_tr=4096):
    """x: (N, C, H, W) -> (N, C), global mean over spatial dims."""
    N, C, H, W = x.shape
    R, S = N * C, H * W

    xf = x.reshape(R, S)                 # contiguous reshape: spatial -> lanes
    itemsize = xf.dtype.itemsize
    if target_block_bytes is None:
        target_block_bytes = _auto_block_bytes()

    # ---- spatial (lane) tile --------------------------------------------
    if S <= max_ts:
        ts = S                           # full-extent last dim: legal, no mask
        mask_tail = False
    else:
        ts = max(128, (max_ts // 128) * 128)
        mask_tail = (S % ts) != 0

    # ---- row (sublane) tile ----------------------------------------------
    # Sub-32-bit dtypes pack along sublanes: round to the packing multiple.
    sub_mult = max(8, 32 // itemsize)    # 8 f32, 16 bf16, 32 int8/fp8
    rows_budget = max(sub_mult, target_block_bytes // (ts * itemsize))
    r_sub = _round_up(R, sub_mult)

    if R < 256 and r_sub <= max_tr:
        # Small row count: single row block (block may exceed R; the garbage
        # rows only hit output lanes that are sliced off below).
        tr = r_sub
    else:
        # Lane-dense output blocks need tr % 128 == 0.  Cap at ~half the rows
        # so the "parallel" axis has >= 2 blocks and both v7x TensorCores get
        # work (harmless on single-core v5e/v6e).
        budget_tr = max(128, (rows_budget // 128) * 128)
        half_tr = _round_up((R + 1) // 2, 128)
        tr = max(128, min(max_tr, budget_tr, half_tr))

    n_row_blocks = pl.cdiv(R, tr)
    n_sp_blocks = pl.cdiv(S, ts)
    r_pad = n_row_blocks * tr

    cost = pl.CostEstimate(
        flops=R * S,
        transcendentals=0,
        bytes_accessed=R * S * itemsize + R * itemsize,
    )

    out = pl.pallas_call(
        functools.partial(
            _gap_kernel,
            inv_hw=1.0 / float(S),
            s_total=S,
            ts=ts,
            mask_tail=mask_tail,
        ),
        out_shape=jax.ShapeDtypeStruct((1, r_pad), x.dtype),
        grid_spec=pltpu.PrefetchScalarGridSpec(
            num_scalar_prefetch=0,
            grid=(n_row_blocks, n_sp_blocks),
            in_specs=[pl.BlockSpec((tr, ts), lambda i, k: (i, k))],
            out_specs=pl.BlockSpec((1, tr), lambda i, k: (0, i)),
            scratch_shapes=[pltpu.VMEM((tr, 1), jnp.float32)],
        ),
        compiler_params=pltpu.CompilerParams(
            dimension_semantics=("parallel", "arbitrary")),
        cost_estimate=cost,
    )(xf)

    return out[0, :R].reshape(N, C)


if __name__ == "__main__":
    key = jax.random.PRNGKey(0)

    # Primary test: shapes implied by the module.
    N, C, H, W = 2, 4, 16, 16
    x = jax.random.normal(key, (N, C, H, W), dtype=jnp.float32)
    out = jax.block_until_ready(my_adaptive_avg_pool2d(x))
    ref = jnp.mean(jnp.mean(x, axis=3), axis=2)
    assert out.shape == (N, C)
    assert jnp.allclose(out, ref, atol=1e-5, rtol=1e-5)

    # Ragged test: H*W not a multiple of 128 and N*C not a multiple of 8
    # (ts == S full-extent path, padded row block).
    x2 = jax.random.normal(jax.random.PRNGKey(0), (2, 5, 7, 7), dtype=jnp.float32)
    out2 = jax.block_until_ready(my_adaptive_avg_pool2d(x2))
    ref2 = jnp.mean(jnp.mean(x2, axis=3), axis=2)
    assert out2.shape == (2, 5)
    assert jnp.allclose(out2, ref2, atol=1e-5, rtol=1e-5)

    # Multi-row-block test: R >= 256 forces >= 2 row blocks (megacore path).
    x3 = jax.random.normal(jax.random.PRNGKey(0), (4, 96, 24, 24), dtype=jnp.float32)
    out3 = jax.block_until_ready(my_adaptive_avg_pool2d(x3))
    ref3 = jnp.mean(jnp.mean(x3, axis=3), axis=2)
    assert out3.shape == (4, 96)
    assert jnp.allclose(out3, ref3, atol=1e-5, rtol=1e-5)

    # Multi-spatial-chunk test: H*W > max_ts exercises the last-chunk-only mask.
    x4 = jax.random.normal(jax.random.PRNGKey(0), (1, 8, 50, 50), dtype=jnp.float32)
    out4 = jax.block_until_ready(my_adaptive_avg_pool2d(x4))
    ref4 = jnp.mean(jnp.mean(x4, axis=3), axis=2)
    assert out4.shape == (1, 8)
    assert jnp.allclose(out4, ref4, atol=1e-5, rtol=1e-5)

    print("KERNEL_OK")
</pallas_src>

<mosaic_0001>
module attributes {stable_mosaic.version = 11 : i64} {
  func.func @_gap_kernel(%arg0: i32, %arg1: i32, %arg2: memref<8x256xf32, #tpu.memory_space<vmem>>, %arg3: memref<1x8xf32, #tpu.memory_space<vmem>>, %arg4: memref<8x1xf32, #tpu.memory_space<vmem>>) attributes {dimension_semantics = [#tpu.dimension_semantics<parallel>, #tpu.dimension_semantics<arbitrary>], iteration_bounds = array<i64: 1, 1>, scalar_prefetch = 0 : i64, scratch_operands = 1 : i64, tpu.core_type = #tpu.core_type<tc>, window_params = [{transform_indices = @transform_0, window_bounds = array<i64: 8, 256>}, {transform_indices = @transform_1, window_bounds = array<i64: 1, 8>}]} {
    %c0_i32 = arith.constant 0 : i32
    %0 = arith.cmpi eq, %arg1, %c0_i32 : i32
    %1 = arith.extui %0 : i1 to i32
    %c0_i32_0 = arith.constant 0 : i32
    %2 = arith.cmpi ne, %1, %c0_i32_0 : i32
    scf.if %2 {
      %cst_8 = arith.constant 0.000000e+00 : f32
      %12 = vector.broadcast %cst_8 : f32 to vector<8x1xf32>
      %c0_9 = arith.constant 0 : index
      %c0_10 = arith.constant 0 : index
      %13 = vector.load %arg4[%c0_9, %c0_10] : memref<8x1xf32, #tpu.memory_space<vmem>>, vector<8x1xf32>
      tpu.vector_store %arg4[%c0_9, %c0_10], %12 {strides = array<i32>} : memref<8x1xf32, #tpu.memory_space<vmem>>, vector<8x1xf32>,
    } else {
    }
    %c0 = arith.constant 0 : index
    %c0_1 = arith.constant 0 : index
    %3 = vector.load %arg2[%c0, %c0_1] : memref<8x256xf32, #tpu.memory_space<vmem>>, vector<8x256xf32>
    %c0_2 = arith.constant 0 : index
    %c0_3 = arith.constant 0 : index
    %4 = vector.load %arg4[%c0_2, %c0_3] : memref<8x1xf32, #tpu.memory_space<vmem>>, vector<8x1xf32>
    %cst = arith.constant dense<0.000000e+00> : vector<8xf32>
    %5 = vector.multi_reduction <add>, %3, %cst [1] : vector<8x256xf32> to vector<8xf32>
    %6 = vector.shape_cast %5 : vector<8xf32> to vector<8x1xf32>
    %7 = arith.addf %4, %6 : vector<8x1xf32>
    %c0_4 = arith.constant 0 : index
    %c0_5 = arith.constant 0 : index
    %8 = vector.load %arg4[%c0_4, %c0_5] : memref<8x1xf32, #tpu.memory_space<vmem>>, vector<8x1xf32>
    tpu.vector_store %arg4[%c0_4, %c0_5], %7 {strides = array<i32>} : memref<8x1xf32, #tpu.memory_space<vmem>>, vector<8x1xf32>,
    %c0_i32_6 = arith.constant 0 : i32
    %9 = arith.cmpi eq, %arg1, %c0_i32_6 : i32
    %10 = arith.extui %9 : i1 to i32
    %c0_i32_7 = arith.constant 0 : i32
    %11 = arith.cmpi ne, %10, %c0_i32_7 : i32
    scf.if %11 {
      %c0_8 = arith.constant 0 : index
      %c0_9 = arith.constant 0 : index
      %12 = vector.load %arg4[%c0_8, %c0_9] : memref<8x1xf32, #tpu.memory_space<vmem>>, vector<8x1xf32>
      %13 = vector.shape_cast %12 : vector<8x1xf32> to vector<8xf32>
      %cst_10 = arith.constant 3.906250e-03 : f32
      %14 = vector.broadcast %cst_10 : f32 to vector<8xf32>
      %15 = arith.mulf %13, %14 : vector<8xf32>
      %16 = vector.shape_cast %15 : vector<8xf32> to vector<1x8xf32>
      %c0_11 = arith.constant 0 : index
      %c0_12 = arith.constant 0 : index
      %17 = vector.load %arg3[%c0_11, %c0_12] : memref<1x8xf32, #tpu.memory_space<vmem>>, vector<1x8xf32>
      tpu.vector_store %arg3[%c0_11, %c0_12], %16 {strides = array<i32>} : memref<1x8xf32, #tpu.memory_space<vmem>>, vector<1x8xf32>,
    } else {
    }
    return
  }
  func.func @transform_0(%arg0: i32, %arg1: i32) -> (i32, i32) {
    %c0_i32 = arith.constant 0 : i32
    return %arg0, %arg1 : i32, i32
  }
  func.func @transform_1(%arg0: i32, %arg1: i32) -> (i32, i32) {
    %c0_i32 = arith.constant 0 : i32
    %c0_i32_0 = arith.constant 0 : i32
    return %c0_i32, %arg0 : i32, i32
  }
}

</mosaic_0001>

<bundles_post_ra>
// kernel: tpu_custom_call.1
= control target key start
LH: loop header
LB: loop body
LE: loop exit
PB: predicated region body
PF: predicated region fallthrough
CT: control target
= control target key end

     0   :  { %6 = vsyncpa [#allocation4], 0  ;;  %s160_s0 = inlined_call_operand.hbm [shape: f32[8,256], index: 0, kind: input, shape index: {}]   ;;  %s161_s1 = inlined_call_operand.hbm [shape: f32[1,8], index: 1, kind: output, shape index: {}]  }
   0x1   :  { %7 = vsyncpa [#allocation5], 0  ;;  %s122_s6 = smov [#allocation3]   ;;  %s74_s10 = scalar_lea.hbm %s160_s0, 256 }
   0x2   :  { %s14_s7 = sshll.u32 %s122_s6, 4  ;;  %p75_p0 = scmp.ne.s32.totalorder %s160_s0, %s74_s10  ;;  %s15_s7 = int_to_ptr.vmem [resolvable:$true] %s14_s7 }
   0x3   :  { %p78_p1 = scmp.lt.u32.totalorder %s74_s10, %s160_s0 }
   0x5   :  { %p80_p2 = pnand %p78_p1, %p75_p0 }
   0x7   :  { %83 = shalt.err (!%p80_p2)
}
   0x8   :  { %s84_s15 = scalar_lea.vmem %s15_s7, 256  ;;  %p89_p4 = scmp.lt.s32.totalorder %s15_s7, %s15_s7 }
   0x9   :  { %p85_p3 = scmp.ne.s32.totalorder %s15_s7, %s84_s15  ;;  %p90_p5 = scmp.lt.s32.totalorder %s84_s15, %s84_s15 }
   0xb   :  { %p91_p6 = por %p90_p5, %p89_p4 }
   0xd   :  { %p92_p7 = pnand %p91_p6, %p85_p3 }
   0xf   :  { %95 = shalt.err (!%p92_p7)
}
  0x10   :  { %17 = dma.hbm_to_vmem [thread:$0]  %s160_s0, 256, %s15_s7, [#allocation4]  }
  0x11   :  { %118 = dma.done.wait [#allocation4], 256  }
  0x12   :  { %119 = vsyncadd [#allocation4], 4294967040  ;;  %vm25_vm0 = vcmask 7168   ;;  %v123_v0 = vmov 0.0   ;;  %v27_v1 = vld [vmem:[#allocation3] sm:$0xff]  ;;  %v28_v2 = vld [vmem:[#allocation3 + $0x8] sm:$0xff]  ;;  %v45_v10 = vlaneseq }
  0x13   :  { %26 = vst.msk [vmem:[#allocation2] sm:$0xff] %vm25_vm0, %v123_v0  ;;  %v30_v3 = vadd.f32 %v28_v2, %v27_v1  ;;  %v124_v4 = vmov 0   ;;  %s125_s0 = smov [#allocation6]   ;;  %vm52_vm1 = vcmask 57344  }
  0x14   :  { %73 = vset.pattern.permute.xlu0 %v124_v4  ;;  %v46_v11 = vand.u32 127, %v45_v10  ;;  %v48_v12 = vshrl.u32 %v45_v10, 7  ;;  %s60_s18 = sshll.u32 %s125_s0, 4  ;;  %s61_s18 = int_to_ptr.vmem [resolvable:$true] %s60_s18 }
  0x15   :  { %31 = vadd.xlane.f32.xlu0 %v30_v3  ;;  %s96_s19 = scalar_lea.vmem %s61_s18, 16  ;;  %s100_s20 = scalar_lea.vmem %s61_s18, 32 }
  0x16   :  { %v49_v13 = vsub.s32 %v46_v11, %v48_v12  ;;  %p97_p8 = scmp.ne.s32.totalorder %s61_s18, %s96_s19  ;;  %p101_p9 = scmp.lt.s32.totalorder %s61_s18, %s61_s18 }
  0x17   :  { %p102_p10 = scmp.lt.s32.totalorder %s100_s20, %s96_s19 }
  0x19   :  { %p103_p11 = por %p102_p10, %p101_p9 }
  0x1a   :  { %v29_v5 = vld [vmem:[#allocation2] sm:$0xff] }
  0x1b   :  { %p104_p12 = pnand %p103_p11, %p97_p8 }
  0xa2   :  { %v32_v6 = vpop.xlane.xlu0 %31 }
  0xa3   :  { %v33_v7 = vadd.f32 %v32_v6, %v29_v5 }
  0xa5   :  { %35 = vst.msk [vmem:[#allocation2] sm:$0xff] %vm25_vm0, %v33_v7 }
  0xac   :  { %v39_v8 = vld [vmem:[#allocation2] sm:$0xff] }
  0xad   :  { %v40_v9 = vmul.f32 0.00390625, %v39_v8 }
  0xaf   :  { %43 = vperm.xlu0 %73, %v40_v9  }
 0x12e   :  { %v44_v14 = vpop.permute.xlu0 %43 }
 0x12f   :  { %v50_v15 = vrot.slane %v44_v14, %v49_v13 }
 0x131   :  { %53 = vst.msk [vmem:[#allocation6] sm:$0x1] %vm52_vm1, %v50_v15 }
 0x132   :  { %107 = shalt.err (!%p104_p12)
}
 0x133   :  { %s108_s23 = scalar_lea.hbm %s161_s1, 16 }
 0x134   :  { %p109_p13 = scmp.ne.s32.totalorder %s161_s1, %s108_s23  ;;  %p112_p0 = scmp.lt.u32.totalorder %s108_s23, %s161_s1 }
 0x136   :  { %p114_p1 = pnand %p112_p0, %p109_p13 }
 0x138   :  { %117 = shalt.err (!%p114_p1)
}
 0x139   :  { %63 = dma.vmem_to_hbm [thread:$0]  %s61_s18, 16, %s161_s1, [#allocation5]  }
 0x13a   :  { %120 = dma.done.wait [#allocation5], 16  }
 0x13b   :  { %121 = vsyncadd [#allocation5], 4294967280 }
 0x13c   :  { %67 = vsyncpa [#allocation4], 1 }
 0x13d   :  { %68 = vsyncpa [#allocation5], 1 }

</bundles_post_ra>
